<compile_context>
chip_gen: v7x
topology: tpu7x:2x2x1
jax: 0.10.0
libtpu: 0.0.40
codegen_flags: <defaults>
</compile_context>

<pallas_src>
import functools

import jax
import jax.numpy as jnp
import numpy as np
from jax import lax
from jax.experimental import pallas as pl
from jax.experimental.pallas import tpu as pltpu


def _round_up(x, m):
    return (x + m - 1) // m * m


def basic_block_kernel(xbuf_ref, w1_ref, w2_ref, o_ref, *, H, W, margin, pout):
    """Fused BasicBlock forward for one batch element.

    xbuf_ref : (1, Cin, Ptot) bf16  flattened reflection-padded input, shifted
                                    right by `margin` lanes, zero-padded to Ptot
    w1_ref   : (9, Mid, Cin)  bf16  3x3 conv weights, tap index = ky*3 + kx
    w2_ref   : (Planes, Mid)  bf16  1x1 conv weights
    o_ref    : (1, Planes, pout)    output on the padded grid (lane-dense);
                                    border / tail positions are garbage and
                                    cropped by the caller
    """
    x = xbuf_ref[0]                                      # (Cin, Ptot) bf16

    # 3x3 conv: 9 static lane-offset windows of the flattened padded image,
    # each contracted against its (Mid, Cin) tap weight and accumulated in f32.
    acc = None
    for ky in range(3):
        for kx in range(3):
            tap = ky * 3 + kx
            off = margin + (ky - 1) * (W + 2) + (kx - 1)
            win = x[:, off:off + pout]                   # (Cin, pout) bf16
            part = jnp.dot(w1_ref[tap], win,
                           preferred_element_type=jnp.float32)   # (Mid, pout)
            acc = part if acc is None else acc + part

    hid = jnp.maximum(acc, 0.2 * acc)                    # LeakyReLU(0.2), f32

    # 1x1 conv == matmul over the channel axis.
    out = jnp.dot(w2_ref[...], hid.astype(jnp.bfloat16),
                  preferred_element_type=jnp.float32)    # (Planes, pout)
    out = jnp.maximum(out, 0.2 * out)                    # LeakyReLU(0.2), f32

    o_ref[...] = out[None].astype(o_ref.dtype)


def basic_block_forward(x, w1_oihw, w2_oihw):
    """x: (N, Cin, H, W) NCHW; w1: (Mid, Cin, 3, 3); w2: (Planes, Mid, 1, 1)."""
    N, Cin, H, W = x.shape
    mid = w1_oihw.shape[0]
    planes = w2_oihw.shape[0]

    P = (H + 2) * (W + 2)                  # padded-grid spatial size
    pout = _round_up(P, 128)               # lane-dense output width per image
    margin = W + 3                         # max |tap lane offset|
    ptot = _round_up(pout + 2 * margin, 128)   # lane-aligned input slab width

    # Reflection pad (1 px), flatten spatial onto the lane axis, shift by
    # `margin` lanes so every tap window is an in-bounds static slice; cast to
    # bf16 here (one fused pass) so the kernel DMAs half the bytes.
    xp = jnp.pad(x, ((0, 0), (0, 0), (1, 1), (1, 1)), mode="reflect")
    xbuf = jnp.pad(xp.reshape(N, Cin, P),
                   ((0, 0), (0, 0), (margin, ptot - P - margin))
                   ).astype(jnp.bfloat16)
    # TODO(synk): for production H/W, fold the reflect-pad/crop into row-tiled
    # BlockSpecs with a 1-row halo (removes these extra HBM passes), add a
    # "parallel" row-tile grid axis for v7x, and raise vmem_limit_bytes on v6e.

    # (O, I, 3, 3) -> (ky, kx, O, I) -> (9, Mid, Cin): tap = ky*3 + kx.
    w1 = jnp.transpose(w1_oihw, (2, 3, 0, 1)).reshape(9, mid, Cin)
    w1 = w1.astype(jnp.bfloat16)
    w2 = w2_oihw[:, :, 0, 0].astype(jnp.bfloat16)        # (Planes, Mid)

    flops = 2 * N * pout * (9 * Cin * mid + mid * planes)
    bytes_accessed = (xbuf.size * xbuf.dtype.itemsize
                      + w1.size * w1.dtype.itemsize
                      + w2.size * w2.dtype.itemsize
                      + N * planes * pout * x.dtype.itemsize)

    out_flat = pl.pallas_call(
        functools.partial(basic_block_kernel,
                          H=H, W=W, margin=margin, pout=pout),
        out_shape=jax.ShapeDtypeStruct((N, planes, pout), x.dtype),
        grid_spec=pltpu.PrefetchScalarGridSpec(
            num_scalar_prefetch=0,
            grid=(N,),
            in_specs=[
                pl.BlockSpec((1, Cin, ptot), lambda n: (n, 0, 0)),
                pl.BlockSpec((9, mid, Cin), lambda n: (0, 0, 0)),
                pl.BlockSpec((planes, mid), lambda n: (0, 0)),
            ],
            out_specs=pl.BlockSpec((1, planes, pout), lambda n: (n, 0, 0)),
        ),
        compiler_params=pltpu.CompilerParams(
            dimension_semantics=("parallel",)),      # feed both v7x TCs
        cost_estimate=pl.CostEstimate(
            flops=flops, transcendentals=0, bytes_accessed=bytes_accessed),
    )(xbuf, w1, w2)

    # Crop the lane padding + padded-grid border back to (N, Planes, H, W)
    # (contiguous slice + reshape; no transposes).
    return out_flat[:, :, :P].reshape(N, planes, H + 2, W + 2)[:, :, 1:-1, 1:-1]


def basic_block_ref(x, w1_oihw, w2_oihw):
    """Pure-JAX f32 reference matching the PyTorch module."""
    xp = jnp.pad(x, ((0, 0), (0, 0), (1, 1), (1, 1)), mode="reflect")
    dn = ("NCHW", "OIHW", "NCHW")
    h = lax.conv_general_dilated(xp, w1_oihw, (1, 1), "VALID",
                                 dimension_numbers=dn)
    h = jnp.where(h > 0, h, 0.2 * h)
    o = lax.conv_general_dilated(h, w2_oihw, (1, 1), "VALID",
                                 dimension_numbers=dn)
    o = jnp.where(o > 0, o, 0.2 * o)
    return o


if __name__ == "__main__":
    # inplanes=4 -> midplanes=2, planes=8 (consistent with the module).
    N, Cin, H, W = 2, 4, 16, 16
    mid, planes = Cin // 2, 8

    key = jax.random.PRNGKey(0)
    kx, k1, k2 = jax.random.split(key, 3)
    x = jax.random.normal(kx, (N, Cin, H, W), dtype=jnp.float32)
    w1 = 0.1 * jax.random.normal(k1, (mid, Cin, 3, 3), dtype=jnp.float32)
    w2 = 0.1 * jax.random.normal(k2, (planes, mid, 1, 1), dtype=jnp.float32)

    out = jax.block_until_ready(basic_block_forward(x, w1, w2))
    ref = jax.block_until_ready(basic_block_ref(x, w1, w2))

    # bf16 MXU operands with f32 accumulation -> compare with bf16 tolerance.
    np.testing.assert_allclose(np.asarray(out), np.asarray(ref),
                               rtol=2e-2, atol=2e-2)

    print("KERNEL_OK")
</pallas_src>

<mosaic_0001>
module attributes {stable_mosaic.version = 11 : i64} {
  func.func @basic_block_kernel(%arg0: i32, %arg1: memref<1x4x512xbf16, #tpu.memory_space<vmem>>, %arg2: memref<9x2x4xbf16, #tpu.memory_space<vmem>>, %arg3: memref<8x2xbf16, #tpu.memory_space<vmem>>, %arg4: memref<1x8x384xf32, #tpu.memory_space<vmem>>) attributes {dimension_semantics = [#tpu.dimension_semantics<parallel>], iteration_bounds = array<i64: 2>, scalar_prefetch = 0 : i64, scratch_operands = 0 : i64, tpu.core_type = #tpu.core_type<tc>, window_params = [{transform_indices = @transform_0, window_bounds = array<i64: 1, 4, 512>}, {pipeline_mode = #tpu.pipeline_mode<synchronous>, transform_indices = @transform_1, window_bounds = array<i64: 9, 2, 4>}, {pipeline_mode = #tpu.pipeline_mode<synchronous>, transform_indices = @transform_2, window_bounds = array<i64: 8, 2>}, {transform_indices = @transform_3, window_bounds = array<i64: 1, 8, 384>}]} {
    %c0 = arith.constant 0 : index
    %c0_0 = arith.constant 0 : index
    %c0_1 = arith.constant 0 : index
    %0 = vector.load %arg1[%c0, %c0_0, %c0_1] : memref<1x4x512xbf16, #tpu.memory_space<vmem>>, vector<1x4x512xbf16>
    %1 = vector.shape_cast %0 : vector<1x4x512xbf16> to vector<4x512xbf16>
    %2 = vector.extract_strided_slice %1 {offsets = [0, 0], sizes = [4, 384], strides = [1, 1]} : vector<4x512xbf16> to vector<4x384xbf16>
    %c0_2 = arith.constant 0 : index
    %c0_3 = arith.constant 0 : index
    %c0_4 = arith.constant 0 : index
    %3 = vector.load %arg2[%c0_2, %c0_3, %c0_4] : memref<9x2x4xbf16, #tpu.memory_space<vmem>>, vector<1x2x4xbf16>
    %4 = vector.shape_cast %3 : vector<1x2x4xbf16> to vector<2x4xbf16>
    %cst = arith.constant dense<0.000000e+00> : vector<2x384xf32>
    %5 = tpu.matmul %4, %2, %cst {dimension_numbers = #tpu.dot_dimension_numbers<[1], [0], [0], [1], [0, 0, 1, 1], [], []>} : vector<2x4xbf16>, vector<4x384xbf16>, vector<2x384xf32> -> vector<2x384xf32>
    %6 = vector.extract_strided_slice %1 {offsets = [0, 1], sizes = [4, 384], strides = [1, 1]} : vector<4x512xbf16> to vector<4x384xbf16>
    %c1 = arith.constant 1 : index
    %c0_5 = arith.constant 0 : index
    %c0_6 = arith.constant 0 : index
    %7 = vector.load %arg2[%c1, %c0_5, %c0_6] : memref<9x2x4xbf16, #tpu.memory_space<vmem>>, vector<1x2x4xbf16>
    %8 = vector.shape_cast %7 : vector<1x2x4xbf16> to vector<2x4xbf16>
    %cst_7 = arith.constant dense<0.000000e+00> : vector<2x384xf32>
    %9 = tpu.matmul %8, %6, %cst_7 {dimension_numbers = #tpu.dot_dimension_numbers<[1], [0], [0], [1], [0, 0, 1, 1], [], []>} : vector<2x4xbf16>, vector<4x384xbf16>, vector<2x384xf32> -> vector<2x384xf32>
    %10 = arith.addf %5, %9 : vector<2x384xf32>
    %11 = vector.extract_strided_slice %1 {offsets = [0, 2], sizes = [4, 384], strides = [1, 1]} : vector<4x512xbf16> to vector<4x384xbf16>
    %c2 = arith.constant 2 : index
    %c0_8 = arith.constant 0 : index
    %c0_9 = arith.constant 0 : index
    %12 = vector.load %arg2[%c2, %c0_8, %c0_9] : memref<9x2x4xbf16, #tpu.memory_space<vmem>>, vector<1x2x4xbf16>
    %13 = vector.shape_cast %12 : vector<1x2x4xbf16> to vector<2x4xbf16>
    %cst_10 = arith.constant dense<0.000000e+00> : vector<2x384xf32>
    %14 = tpu.matmul %13, %11, %cst_10 {dimension_numbers = #tpu.dot_dimension_numbers<[1], [0], [0], [1], [0, 0, 1, 1], [], []>} : vector<2x4xbf16>, vector<4x384xbf16>, vector<2x384xf32> -> vector<2x384xf32>
    %15 = arith.addf %10, %14 : vector<2x384xf32>
    %16 = vector.extract_strided_slice %1 {offsets = [0, 18], sizes = [4, 384], strides = [1, 1]} : vector<4x512xbf16> to vector<4x384xbf16>
    %c3 = arith.constant 3 : index
    %c0_11 = arith.constant 0 : index
    %c0_12 = arith.constant 0 : index
    %17 = vector.load %arg2[%c3, %c0_11, %c0_12] : memref<9x2x4xbf16, #tpu.memory_space<vmem>>, vector<1x2x4xbf16>
    %18 = vector.shape_cast %17 : vector<1x2x4xbf16> to vector<2x4xbf16>
    %cst_13 = arith.constant dense<0.000000e+00> : vector<2x384xf32>
    %19 = tpu.matmul %18, %16, %cst_13 {dimension_numbers = #tpu.dot_dimension_numbers<[1], [0], [0], [1], [0, 0, 1, 1], [], []>} : vector<2x4xbf16>, vector<4x384xbf16>, vector<2x384xf32> -> vector<2x384xf32>
    %20 = arith.addf %15, %19 : vector<2x384xf32>
    %21 = vector.extract_strided_slice %1 {offsets = [0, 19], sizes = [4, 384], strides = [1, 1]} : vector<4x512xbf16> to vector<4x384xbf16>
    %c4 = arith.constant 4 : index
    %c0_14 = arith.constant 0 : index
    %c0_15 = arith.constant 0 : index
    %22 = vector.load %arg2[%c4, %c0_14, %c0_15] : memref<9x2x4xbf16, #tpu.memory_space<vmem>>, vector<1x2x4xbf16>
    %23 = vector.shape_cast %22 : vector<1x2x4xbf16> to vector<2x4xbf16>
    %cst_16 = arith.constant dense<0.000000e+00> : vector<2x384xf32>
    %24 = tpu.matmul %23, %21, %cst_16 {dimension_numbers = #tpu.dot_dimension_numbers<[1], [0], [0], [1], [0, 0, 1, 1], [], []>} : vector<2x4xbf16>, vector<4x384xbf16>, vector<2x384xf32> -> vector<2x384xf32>
    %25 = arith.addf %20, %24 : vector<2x384xf32>
    %26 = vector.extract_strided_slice %1 {offsets = [0, 20], sizes = [4, 384], strides = [1, 1]} : vector<4x512xbf16> to vector<4x384xbf16>
    %c5 = arith.constant 5 : index
    %c0_17 = arith.constant 0 : index
    %c0_18 = arith.constant 0 : index
    %27 = vector.load %arg2[%c5, %c0_17, %c0_18] : memref<9x2x4xbf16, #tpu.memory_space<vmem>>, vector<1x2x4xbf16>
    %28 = vector.shape_cast %27 : vector<1x2x4xbf16> to vector<2x4xbf16>
    %cst_19 = arith.constant dense<0.000000e+00> : vector<2x384xf32>
    %29 = tpu.matmul %28, %26, %cst_19 {dimension_numbers = #tpu.dot_dimension_numbers<[1], [0], [0], [1], [0, 0, 1, 1], [], []>} : vector<2x4xbf16>, vector<4x384xbf16>, vector<2x384xf32> -> vector<2x384xf32>
    %30 = arith.addf %25, %29 : vector<2x384xf32>
    %31 = vector.extract_strided_slice %1 {offsets = [0, 36], sizes = [4, 384], strides = [1, 1]} : vector<4x512xbf16> to vector<4x384xbf16>
    %c6 = arith.constant 6 : index
    %c0_20 = arith.constant 0 : index
    %c0_21 = arith.constant 0 : index
    %32 = vector.load %arg2[%c6, %c0_20, %c0_21] : memref<9x2x4xbf16, #tpu.memory_space<vmem>>, vector<1x2x4xbf16>
    %33 = vector.shape_cast %32 : vector<1x2x4xbf16> to vector<2x4xbf16>
    %cst_22 = arith.constant dense<0.000000e+00> : vector<2x384xf32>
    %34 = tpu.matmul %33, %31, %cst_22 {dimension_numbers = #tpu.dot_dimension_numbers<[1], [0], [0], [1], [0, 0, 1, 1], [], []>} : vector<2x4xbf16>, vector<4x384xbf16>, vector<2x384xf32> -> vector<2x384xf32>
    %35 = arith.addf %30, %34 : vector<2x384xf32>
    %36 = vector.extract_strided_slice %1 {offsets = [0, 37], sizes = [4, 384], strides = [1, 1]} : vector<4x512xbf16> to vector<4x384xbf16>
    %c7 = arith.constant 7 : index
    %c0_23 = arith.constant 0 : index
    %c0_24 = arith.constant 0 : index
    %37 = vector.load %arg2[%c7, %c0_23, %c0_24] : memref<9x2x4xbf16, #tpu.memory_space<vmem>>, vector<1x2x4xbf16>
    %38 = vector.shape_cast %37 : vector<1x2x4xbf16> to vector<2x4xbf16>
    %cst_25 = arith.constant dense<0.000000e+00> : vector<2x384xf32>
    %39 = tpu.matmul %38, %36, %cst_25 {dimension_numbers = #tpu.dot_dimension_numbers<[1], [0], [0], [1], [0, 0, 1, 1], [], []>} : vector<2x4xbf16>, vector<4x384xbf16>, vector<2x384xf32> -> vector<2x384xf32>
    %40 = arith.addf %35, %39 : vector<2x384xf32>
    %41 = vector.extract_strided_slice %1 {offsets = [0, 38], sizes = [4, 384], strides = [1, 1]} : vector<4x512xbf16> to vector<4x384xbf16>
    %c8 = arith.constant 8 : index
    %c0_26 = arith.constant 0 : index
    %c0_27 = arith.constant 0 : index
    %42 = vector.load %arg2[%c8, %c0_26, %c0_27] : memref<9x2x4xbf16, #tpu.memory_space<vmem>>, vector<1x2x4xbf16>
    %43 = vector.shape_cast %42 : vector<1x2x4xbf16> to vector<2x4xbf16>
    %cst_28 = arith.constant dense<0.000000e+00> : vector<2x384xf32>
    %44 = tpu.matmul %43, %41, %cst_28 {dimension_numbers = #tpu.dot_dimension_numbers<[1], [0], [0], [1], [0, 0, 1, 1], [], []>} : vector<2x4xbf16>, vector<4x384xbf16>, vector<2x384xf32> -> vector<2x384xf32>
    %45 = arith.addf %40, %44 : vector<2x384xf32>
    %cst_29 = arith.constant 2.000000e-01 : f32
    %46 = vector.broadcast %cst_29 : f32 to vector<2x384xf32>
    %47 = arith.mulf %46, %45 : vector<2x384xf32>
    %48 = arith.maximumf %45, %47 : vector<2x384xf32>
    %c0_30 = arith.constant 0 : index
    %c0_31 = arith.constant 0 : index
    %49 = vector.load %arg3[%c0_30, %c0_31] : memref<8x2xbf16, #tpu.memory_space<vmem>>, vector<8x2xbf16>
    %50 = arith.truncf %48 : vector<2x384xf32> to vector<2x384xbf16>
    %cst_32 = arith.constant dense<0.000000e+00> : vector<8x384xf32>
    %51 = tpu.matmul %49, %50, %cst_32 {dimension_numbers = #tpu.dot_dimension_numbers<[1], [0], [0], [1], [0, 0, 1, 1], [], []>} : vector<8x2xbf16>, vector<2x384xbf16>, vector<8x384xf32> -> vector<8x384xf32>
    %cst_33 = arith.constant 2.000000e-01 : f32
    %52 = vector.broadcast %cst_33 : f32 to vector<8x384xf32>
    %53 = arith.mulf %52, %51 : vector<8x384xf32>
    %54 = arith.maximumf %51, %53 : vector<8x384xf32>
    %55 = vector.shape_cast %54 : vector<8x384xf32> to vector<1x8x384xf32>
    %c0_34 = arith.constant 0 : index
    %c0_35 = arith.constant 0 : index
    %c0_36 = arith.constant 0 : index
    %56 = vector.load %arg4[%c0_34, %c0_35, %c0_36] : memref<1x8x384xf32, #tpu.memory_space<vmem>>, vector<1x8x384xf32>
    tpu.vector_store %arg4[%c0_34, %c0_35, %c0_36], %55 {strides = array<i32>} : memref<1x8x384xf32, #tpu.memory_space<vmem>>, vector<1x8x384xf32>,
    return
  }
  func.func @transform_0(%arg0: i32) -> (i32, i32, i32) {
    %c0_i32 = arith.constant 0 : i32
    %c0_i32_0 = arith.constant 0 : i32
    %c0_i32_1 = arith.constant 0 : i32
    return %arg0, %c0_i32, %c0_i32_0 : i32, i32, i32
  }
  func.func @transform_1(%arg0: i32) -> (i32, i32, i32) {
    %c0_i32 = arith.constant 0 : i32
    %c0_i32_0 = arith.constant 0 : i32
    %c0_i32_1 = arith.constant 0 : i32
    %c0_i32_2 = arith.constant 0 : i32
    return %c0_i32, %c0_i32_0, %c0_i32_1 : i32, i32, i32
  }
  func.func @transform_2(%arg0: i32) -> (i32, i32) {
    %c0_i32 = arith.constant 0 : i32
    %c0_i32_0 = arith.constant 0 : i32
    %c0_i32_1 = arith.constant 0 : i32
    return %c0_i32, %c0_i32_0 : i32, i32
  }
  func.func @transform_3(%arg0: i32) -> (i32, i32, i32) {
    %c0_i32 = arith.constant 0 : i32
    %c0_i32_0 = arith.constant 0 : i32
    %c0_i32_1 = arith.constant 0 : i32
    return %arg0, %c0_i32, %c0_i32_0 : i32, i32, i32
  }
}

</mosaic_0001>

<bundles_post_ra>
// kernel: tpu_custom_call.1
= control target key start
LH: loop header
LB: loop body
LE: loop exit
PB: predicated region body
PF: predicated region fallthrough
CT: control target
= control target key end

     0   :  { %8 = vsyncpa [#allocation3], 0  ;;  %s1929_s0 = inlined_call_operand.vmem [shape: bf16[2,4,512], index: 0, kind: input, shape index: {}]   ;;  %s1930_s1 = inlined_call_operand.vmem [shape: bf16[9,2,4], index: 1, kind: input, shape index: {}]   ;;  %s1931_s2 = inlined_call_operand.vmem [shape: bf16[8,2], index: 2, kind: input, shape index: {}]   ;;  %s1932_s3 = inlined_call_operand.hbm [shape: f32[2,8,384], index: 3, kind: output, shape index: {}]  }
   0x1   :  { %10 = vsyncpa [#allocation3 + $0x1], 0  ;;  %s1693_s12 = smov 0   ;;  %s1695_s13 = smov 0  }
   0x2   :  { %s1697_s14 = smov 0   ;;  %s1699_s15 = smov 0  }
   0x3 LB: > { %s1714_s16 = sadd.s32 4294967295, %s1658_s15   ;;  %s1350_s17 = sadd.s32 4294967294, %s1658_s15   ;;  %s1658_s15 = sphi %s1699_s15, %s1938_s15   ;;  %s1654_s14 = sphi %s1697_s14, %s1937_s14   ;;  %s1650_s13 = sphi %s1695_s13, %s1936_s13   ;;  %s1646_s12 = sphi %s1693_s12, %s1935_s12  }
   0x4   : > { %s1718_s18 = sadd.s32 1, %s1658_s15   ;;  %s91_s19 = sadd.s32 1, %s1654_s14 }
   0x5   : > { %s88_s20 = ssub.s32 %s1658_s15, %s1718_s18  ;;  %p101_p0 = scmp.ne.s32.totalorder %s1654_s14, %s1650_s13 }
   0x6   : > { %p89_p1 = scmp.eq.s32.totalorder %s88_s20, 0  ;;  %p102_p2 = scmp.eq.s32.totalorder %s1714_s16, 1 }
   0x7   : > { %p107_p3 = scmp.ne.s32.totalorder %s1650_s13, %s1646_s12  ;;  %p108_p4 = scmp.eq.s32.totalorder %s1350_s17, 1 }
   0x8   : > { %s1729_s21 = scalar_select %p89_p1, %s1654_s14, %s91_s19  }
   0x9   : > { %p1731_p5 = por %p102_p2, %p101_p0  ;;  %p1735_p6 = por %p108_p4, %p107_p3 }
   0xa   : > { %p1353_p7 = scmp.ge.s32.totalorder %s1658_s15, 1  ;;  %p140_p8 = scmp.lt.s32.totalorder %s1658_s15, 3 }
   0xc   : > { %p141_p9 = pnand %p1353_p7, %p140_p8 }
   0xd   : > { %p164_p10 = scmp.lt.s32.totalorder (!%p141_p9), %s1714_s16, 1  ;;  %v179_v0 = vlaneseq (!%p141_p9)  ;;  %v1660_v1 = vmov (!%p141_p9), 1983009808   ;;  %v1661_v5 = vmov (!%p141_p9), 0.0   ;;  %v1662_v6 = vmov (!%p141_p9), 0   ;;  %s1664_s29 = smov (!%p141_p9), 127  }
   0xe   : > { %144 = sbr.rel (%p141_p9) target bundleno = 702 (0x2be), region = 32  ;;  %v177_v2 = vunpack.c.l.s4 (!%p141_p9), %v1660_v1  ;;  %1418 = vmatprep.subr.bf16.mxu1 (!%p141_p9), %v1661_v5  ;;  %250 = vmatprep.mubr.bf16.mxu0 (!%p141_p9), %v1662_v6  ;;  %vm1663_vm0 = vmmov (!%p141_p9), 0   ;;  %s1665_s30 = smov (!%p141_p9), 126   ;;  %vm200_vm1 = vcmask (!%p141_p9), 1039360   ;;  %vm208_vm2 = vcmask (!%p141_p9), 1041408  }
   0xf   : > { %v180_v3 = vshrl.u32 (!%p141_p9), %v179_v0, 7  ;;  %1420 = vmatprep.mubr.msk.bf16.mxu1 (!%p141_p9), %vm1663_vm0, %v1661_v5  ;;  %s1666_s4 = smov (!%p141_p9), 110   ;;  %s1667_s5 = smov (!%p141_p9), 109   ;;  %v1356_v22 = vld [vmem:[%s1930_s1 + $0x1] sm:$0x1] (!%p141_p9)  ;;  %vm204_vm3 = vcmask (!%p141_p9), 31744  }
  0x10   : > { %v178_v4 = vunpack.c.0.s8 (!%p141_p9), %v177_v2  ;;  %s1668_s6 = smov (!%p141_p9), 108   ;;  %s1669_s7 = smov (!%p141_p9), 92   ;;  %vm402_vm4 = vcmask (!%p141_p9), 1031168   ;;  %vm512_vm5 = vcmask (!%p141_p9), 900096   ;;  %v171_v34 = vld [vmem:[%s1930_s1] sm:$0x1] (!%p141_p9) }
  0x11   : > { %s1670_s8 = smov (!%p141_p9), 91   ;;  %s1671_s9 = smov (!%p141_p9), 90   ;;  %vm622_vm6 = vcmask (!%p141_p9), 891904   ;;  %v1363_v45 = vld [vmem:[%s1930_s1 + $0x2] sm:$0x1] (!%p141_p9)  ;;  %vm732_vm7 = vcmask (!%p141_p9), 883712  }
  0x12   : > { %v181_v7 = vsub.s32 (!%p141_p9), %v178_v4, %v180_v3  ;;  %v1367_v55 = vld [vmem:[%s1930_s1 + $0x3] sm:$0x1] (!%p141_p9)  ;;  %vm842_vm8 = vcmask (!%p141_p9), 752640   ;;  %v1371_v1 = vld [vmem:[%s1930_s1 + $0x4] sm:$0x1] (!%p141_p9)  ;;  %vm952_vm9 = vcmask (!%p141_p9), 744448  }
  0x13   : > { %vm1062_vm10 = vcmask (!%p141_p9), 736256   ;;  %vm1176_vm11 = vcmask (!%p141_p9), 1040384   ;;  %vm1172_vm12 = vcmask (!%p141_p9), 15360   ;;  %s161_s17 = sand.u32 (!%p141_p9), 1, %s1650_s13   ;;  %s1543_s20 = smul.u32 (!%p141_p9), 384, %s1714_s16 }
  0x14   : > { %s1542_s19 = smul.u32 (!%p141_p9), 24, %s161_s17 }
  0x15   : > { %s165_s24 = scalar_select %p164_p10, %s1714_s16, 1 }
  0x16   : > { %s1887_s16 = scalar_lea.hbm %s1932_s3, %s1543_s20 }
  0x17   : > { %s1397_s25 = sshll.u32 %s165_s24, 3  ;;  %s163_s24 = scalar_lea.vmem [#allocation2], %s1542_s19 }
  0x18   : > { %s168_s28 = scalar_lea.vmem %s1929_s0, %s1397_s25  ;;  %s1291_s25 = sshll.u32 %s163_s24, 4  ;;  %s1889_s25 = int_to_ptr.vmem [resolvable:$true] %s1291_s25 }
  0x19   : > { %v170_v8 = vld [vmem:[%s168_s28] sm:$0xff]  ;;  %s1277_s28 = scalar_lea.sflag [#allocation3], %s161_s17 }
  0x1a   : > { %v182_v9 = vrot.slane %v170_v8, %v181_v7  ;;  %v175_v10 = vcombine.high %v170_v8, %v170_v8 }
  0x1c   : > { %192 = vrot.lane.b32.xlu0 %v182_v9, %s1664_s29  ;;  %v189_v11 = vrot.slane %v175_v10, %v181_v7  ;;  %v190_v12 = vcombine.high %v182_v9, %v182_v9  ;;  %v303_v24 = vsel %vm208_vm2, %v182_v9, 0 }
  0x1e   : > { %196 = vrot.lane.b32.xlu1 %v189_v11, %s1664_s29  ;;  %v191_v13 = vcombine.high %v189_v11, %v189_v11  ;;  %v309_v26 = vsel %vm208_vm2, %v189_v11, 0 }
  0x20   : > { %194 = vrot.lane.b32.xlu0 %v190_v12, %s1664_s29 }
  0x22   : > { %198 = vrot.lane.b32.xlu1 %v191_v13, %s1664_s29  ;;  %s1596_s29 = scalar_lea.vmem %s1889_s25, 384 }
  0x23   : > { %p1597_p11 = scmp.ne.s32.totalorder %s1889_s25, %s1596_s29 }
  0x24   : > { %394 = vrot.lane.b32.xlu0 %v182_v9, %s1665_s30 }
  0x25   : > { %p1598_p12 = pnand %p1597_p11, %p1731_p5 }
  0x26   : > { %396 = vrot.lane.b32.xlu1 %v190_v12, %s1665_s30 }
  0x27   : > { %p1599_p13 = pneg %p1598_p12 }
  0x28   : > { %398 = vrot.lane.b32.xlu0 %v189_v11, %s1665_s30 }
  0x2a   : > { %400 = vrot.lane.b32.xlu1 %v191_v13, %s1665_s30  ;;  %s1672_s30 = smov [#allocation2]  }
  0x2c   : > { %504 = vrot.lane.b32.xlu0 %v182_v9, %s1666_s4 }
  0x2e   : > { %506 = vrot.lane.b32.xlu1 %v190_v12, %s1666_s4 }
  0x30   : > { %508 = vrot.lane.b32.xlu0 %v189_v11, %s1666_s4 }
  0x32   : > { %510 = vrot.lane.b32.xlu1 %v191_v13, %s1666_s4  ;;  %s1600_s4 = sshll.u32 %s1672_s30, 4  ;;  %s1601_s4 = int_to_ptr.vmem [resolvable:$false] %s1600_s4 }
  0x33   : > { %p1603_p0 = scmp.lt.s32.totalorder %s1889_s25, %s1601_s4 }
  0x34   : > { %614 = vrot.lane.b32.xlu0 %v182_v9, %s1667_s5 }
  0x36   : > { %616 = vrot.lane.b32.xlu1 %v190_v12, %s1667_s5 }
  0x38   : > { %618 = vrot.lane.b32.xlu0 %v189_v11, %s1667_s5 }
  0x3a   : > { %620 = vrot.lane.b32.xlu1 %v191_v13, %s1667_s5  ;;  %s1602_s5 = scalar_lea.vmem %s1601_s4, 768 }
  0x3b   : > { %p1604_p1 = scmp.lt.s32.totalorder %s1602_s5, %s1596_s29 }
  0x3c   : > { %724 = vrot.lane.b32.xlu0 %v182_v9, %s1668_s6 }
  0x3d   : > { %p1605_p2 = por %p1604_p1, %p1603_p0 }
  0x3e   : > { %726 = vrot.lane.b32.xlu1 %v190_v12, %s1668_s6 }
  0x3f   : > { %p1606_p3 = pnand %p1605_p2, %p1599_p13 }
  0x40   : > { %728 = vrot.lane.b32.xlu0 %v189_v11, %s1668_s6 }
  0x42   : > { %730 = vrot.lane.b32.xlu1 %v191_v13, %s1668_s6 }
  0x44   : > { %834 = vrot.lane.b32.xlu0 %v182_v9, %s1669_s7 }
  0x46   : > { %836 = vrot.lane.b32.xlu1 %v190_v12, %s1669_s7 }
  0x48   : > { %838 = vrot.lane.b32.xlu0 %v189_v11, %s1669_s7 }
  0x4a   : > { %840 = vrot.lane.b32.xlu1 %v191_v13, %s1669_s7 }
  0x4c   : > { %944 = vrot.lane.b32.xlu0 %v182_v9, %s1670_s8 }
  0x4e   : > { %946 = vrot.lane.b32.xlu1 %v190_v12, %s1670_s8 }
  0x50   : > { %948 = vrot.lane.b32.xlu0 %v189_v11, %s1670_s8 }
  0x52   : > { %950 = vrot.lane.b32.xlu1 %v191_v13, %s1670_s8 }
  0x54   : > { %1054 = vrot.lane.b32.xlu0 %v182_v9, %s1671_s9 }
  0x56   : > { %1056 = vrot.lane.b32.xlu1 %v190_v12, %s1671_s9 }
  0x58   : > { %1058 = vrot.lane.b32.xlu0 %v189_v11, %s1671_s9 }
  0x5a   : > { %1060 = vrot.lane.b32.xlu1 %v191_v13, %s1671_s9  ;;  %v1375_v13 = vld [vmem:[%s1930_s1 + $0x5] sm:$0x1] }
  0x8e   : > { %v193_v14 = vpop.permute.xlu0 %192 }
  0x90   : > { %v197_v15 = vpop.permute.xlu1 %196 }
  0x92   : > { %v195_v16 = vpop.permute.xlu0 %194 }
  0x93   : > { %v202_v17 = vsel %vm200_vm1, %v195_v16, %v197_v15  ;;  %v201_v18 = vsel %vm200_vm1, %v193_v14, %v195_v16 }
  0x94   : > { %1357 = vmatprep.subr.msk.bf16.mxu0 %vm208_vm2, %v202_v17  ;;  %v199_v19 = vpop.permute.xlu1 %198  ;;  %v210_v20 = vsel %vm208_vm2, %v201_v18, 0 }
  0x95   : > { %219 = vmatpush1.bf16.msra.mxu0 %v210_v20  ;;  %v203_v21 = vsel %vm200_vm1, %v197_v15, %v199_v19 }
  0x96   : > { %v216_v23 = vsel %vm208_vm2, %v203_v21, 0  ;;  %1360 = vmatprep.subr.msk.bf16.mxu0 %vm208_vm2, %v190_v12  ;;  %v395_v25 = vpop.permute.xlu0 %394 }
  0x97   : > { %1419 = vmatpush3.bf16.msra.mxu1 %v216_v23  ;;  %v1379_v23 = vld [vmem:[%s1930_s1 + $0x6] sm:$0x1] }
  0x98   : > { %1358 = vmatmul.mubr.msk.bf16.vlgmr.msra.gmra.mrb[0].mxu0 %vm204_vm3, %v1356_v22  ;;  %1424 = vmatprep.subr.bf16.mxu1 %v1661_v5  ;;  %v397_v27 = vpop.permute.xlu1 %396 }
  0x99   : > { %312 = vmatpush1.bf16.msra.mxu0 %v303_v24  ;;  %343 = vmatprep.mubr.bf16.mxu0 %v1662_v6  ;;  %v403_v32 = vsel %vm402_vm4, %v395_v25, %v397_v27 }
  0x9a   : > { %1421 = vmatmul.mubr.msk.bf16.vlgmr.msra.gmra.mrb[0].mxu1 %vm204_vm3, %v1356_v22  ;;  %v399_v28 = vpop.permute.xlu0 %398  ;;  %v410_v36 = vsel %vm208_vm2, %v403_v32, 0 }
  0x9b   : > { %1425 = vmatpush3.bf16.msra.mxu1 %v309_v26  ;;  %v404_v29 = vsel %vm402_vm4, %v397_v27, %v399_v28  ;;  %1426 = vmatprep.mubr.msk.bf16.mxu1 %vm1663_vm0, %v1661_v5 }
  0x9c   : > { %1364 = vmatprep.subr.msk.bf16.mxu0 %vm208_vm2, %v404_v29  ;;  %v401_v30 = vpop.permute.xlu1 %400  ;;  %1430 = vmatprep.subr.bf16.mxu1 %v1661_v5 }
  0x9d   : > { %v405_v35 = vsel %vm402_vm4, %v399_v28, %v401_v30  ;;  %v1383_v30 = vld [vmem:[%s1930_s1 + $0x7] sm:$0x1] }
  0x9e   : > { %v505_v31 = vpop.permute.xlu0 %504  ;;  %v416_v39 = vsel %vm208_vm2, %v405_v35, 0 }
  0xa0   : > { %v507_v33 = vpop.permute.xlu1 %506 }
  0xa1   : > { %v513_v42 = vsel %vm512_vm5, %v505_v31, %v507_v33 }
  0xa2   : > { %v509_v37 = vpop.permute.xlu0 %508  ;;  %v520_v47 = vsel %vm208_vm2, %v513_v42, 0 }
  0xa3   : > { %v514_v38 = vsel %vm512_vm5, %v507_v33, %v509_v37 }
  0xa4   : > { %1361 = vmatmul.mubr.msk.bf16.vlgmr.msra.gmra.mrb[0].mxu0 %vm204_vm3, %v171_v34  ;;  %v511_v41 = vpop.permute.xlu1 %510 }
  0xa5   : > { %419 = vmatpush1.bf16.msra.mxu0 %v410_v36  ;;  %450 = vmatprep.mubr.bf16.mxu0 %v1662_v6  ;;  %v515_v46 = vsel %vm512_vm5, %v509_v37, %v511_v41 }
  0xa6   : > { %1427 = vmatmul.mubr.msk.bf16.vlgmr.msra.gmra.mrb[0].mxu1 %vm204_vm3, %v171_v34  ;;  %1368 = vmatprep.subr.msk.bf16.mxu0 %vm208_vm2, %v514_v38  ;;  %v615_v40 = vpop.permute.xlu0 %614  ;;  %v526_v49 = vsel %vm208_vm2, %v515_v46, 0  ;;  %v1387_v34 = vld [vmem:[%s1930_s1 + $0x8] sm:$0x1] }
  0xa7   : > { %1431 = vmatpush3.bf16.msra.mxu1 %v416_v39  ;;  %1432 = vmatprep.mubr.msk.bf16.mxu1 %vm1663_vm0, %v1661_v5 }
  0xa8   : > { %1436 = vmatprep.subr.bf16.mxu1 %v1661_v5  ;;  %v617_v44 = vpop.permute.xlu1 %616 }
  0xa9   : > { %v623_v52 = vsel %vm622_vm6, %v615_v40, %v617_v44 }
  0xaa   : > { %v619_v43 = vpop.permute.xlu0 %618  ;;  %v630_v57 = vsel %vm208_vm2, %v623_v52, 0  ;;  %v1168_v52 = vld [vmem:[%s1931_s2] sm:$0xf] }
  0xab   : > { %v624_v48 = vsel %vm622_vm6, %v617_v44, %v619_v43 }
  0xac   : > { %v621_v51 = vpop.permute.xlu1 %620 }
  0xad   : > { %v625_v56 = vsel %vm622_vm6, %v619_v43, %v621_v51 }
  0xae   : > { %v725_v50 = vpop.permute.xlu0 %724  ;;  %v636_v59 = vsel %vm208_vm2, %v625_v56, 0 }
  0xb0   : > { %1365 = vmatmul.mubr.msk.bf16.vlgmr.msra.gmra.mrb[0].mxu0 %vm204_vm3, %v1363_v45  ;;  %v727_v54 = vpop.permute.xlu1 %726 }
  0xb1   : > { %529 = vmatpush1.bf16.msra.mxu0 %v520_v47  ;;  %560 = vmatprep.mubr.bf16.mxu0 %v1662_v6  ;;  %v733_v62 = vsel %vm732_vm7, %v725_v50, %v727_v54 }
  0xb2   : > { %1433 = vmatmul.mubr.msk.bf16.vlgmr.msra.gmra.mrb[0].mxu1 %vm204_vm3, %v1363_v45  ;;  %1372 = vmatprep.subr.msk.bf16.mxu0 %vm208_vm2, %v624_v48  ;;  %v729_v53 = vpop.permute.xlu0 %728  ;;  %v740_v3 = vsel %vm208_vm2, %v733_v62, 0 }
  0xb3   : > { %1437 = vmatpush3.bf16.msra.mxu1 %v526_v49  ;;  %1438 = vmatprep.mubr.msk.bf16.mxu1 %vm1663_vm0, %v1661_v5  ;;  %v734_v58 = vsel %vm732_vm7, %v727_v54, %v729_v53 }
  0xb4   : > { %1442 = vmatprep.subr.bf16.mxu1 %v1661_v5  ;;  %v731_v61 = vpop.permute.xlu1 %730 }
  0xb5   : > { %v735_v2 = vsel %vm732_vm7, %v729_v53, %v731_v61 }
  0xb6   : > { %v835_v60 = vpop.permute.xlu0 %834  ;;  %v746_v7 = vsel %vm208_vm2, %v735_v2, 0 }
  0xb8   : > { %v837_v0 = vpop.permute.xlu1 %836 }
  0xb9   : > { %v843_v10 = vsel %vm842_vm8, %v835_v60, %v837_v0 }
  0xba   : > { %v839_v63 = vpop.permute.xlu0 %838  ;;  %v850_v15 = vsel %vm208_vm2, %v843_v10, 0 }
  0xbb   : > { %v844_v4 = vsel %vm842_vm8, %v837_v0, %v839_v63 }
  0xbc   : > { %1369 = vmatmul.mubr.msk.bf16.vlgmr.msra.gmra.mrb[0].mxu0 %vm204_vm3, %v1367_v55  ;;  %v841_v9 = vpop.permute.xlu1 %840 }
  0xbd   : > { %639 = vmatpush1.bf16.msra.mxu0 %v630_v57  ;;  %670 = vmatprep.mubr.bf16.mxu0 %v1662_v6  ;;  %v845_v14 = vsel %vm842_vm8, %v839_v63, %v841_v9 }
  0xbe   : > { %1439 = vmatmul.mubr.msk.bf16.vlgmr.msra.gmra.mrb[0].mxu1 %vm204_vm3, %v1367_v55  ;;  %1376 = vmatprep.subr.msk.bf16.mxu0 %vm208_vm2, %v734_v58  ;;  %v945_v8 = vpop.permute.xlu0 %944  ;;  %v856_v17 = vsel %vm208_vm2, %v845_v14, 0 }
  0xbf   : > { %1443 = vmatpush3.bf16.msra.mxu1 %v636_v59  ;;  %1444 = vmatprep.mubr.msk.bf16.mxu1 %vm1663_vm0, %v1661_v5 }
  0xc0   : > { %1448 = vmatprep.subr.bf16.mxu1 %v1661_v5  ;;  %v947_v12 = vpop.permute.xlu1 %946 }
  0xc1   : > { %v953_v20 = vsel %vm952_vm9, %v945_v8, %v947_v12 }
  0xc2   : > { %v949_v11 = vpop.permute.xlu0 %948  ;;  %v960_v25 = vsel %vm208_vm2, %v953_v20, 0 }
  0xc3   : > { %v954_v16 = vsel %vm952_vm9, %v947_v12, %v949_v11 }
  0xc4   : > { %v951_v19 = vpop.permute.xlu1 %950 }
  0xc5   : > { %v955_v24 = vsel %vm952_vm9, %v949_v11, %v951_v19 }
  0xc6   : > { %v1055_v18 = vpop.permute.xlu0 %1054  ;;  %v966_v27 = vsel %vm208_vm2, %v955_v24, 0 }
  0xc8   : > { %1373 = vmatmul.mubr.msk.bf16.vlgmr.msra.gmra.mrb[0].mxu0 %vm204_vm3, %v1371_v1  ;;  %v1057_v22 = vpop.permute.xlu1 %1056 }
  0xc9   : > { %749 = vmatpush1.bf16.msra.mxu0 %v740_v3  ;;  %780 = vmatprep.mubr.bf16.mxu0 %v1662_v6  ;;  %v1063_v29 = vsel %vm1062_vm10, %v1055_v18, %v1057_v22 }
  0xca   : > { %1445 = vmatmul.mubr.msk.bf16.vlgmr.msra.gmra.mrb[0].mxu1 %vm204_vm3, %v1371_v1  ;;  %1380 = vmatprep.subr.msk.bf16.mxu0 %vm208_vm2, %v844_v4  ;;  %v1059_v21 = vpop.permute.xlu0 %1058  ;;  %v1070_v32 = vsel %vm208_vm2, %v1063_v29, 0 }
  0xcb   : > { %1449 = vmatpush3.bf16.msra.mxu1 %v746_v7  ;;  %1450 = vmatprep.mubr.msk.bf16.mxu1 %vm1663_vm0, %v1661_v5  ;;  %v1064_v26 = vsel %vm1062_vm10, %v1057_v22, %v1059_v21 }
  0xcc   : > { %1454 = vmatprep.subr.bf16.mxu1 %v1661_v5  ;;  %v1061_v28 = vpop.permute.xlu1 %1060 }
  0xcd   : > { %v1065_v31 = vsel %vm1062_vm10, %v1059_v21, %v1061_v28 }
  0xce   : > { %v1076_v33 = vsel %vm208_vm2, %v1065_v31, 0 }
  0xd4   : > { %1377 = vmatmul.mubr.msk.bf16.vlgmr.msra.gmra.mrb[0].mxu0 %vm204_vm3, %v1375_v13 }
  0xd5   : > { %859 = vmatpush1.bf16.msra.mxu0 %v850_v15  ;;  %890 = vmatprep.mubr.bf16.mxu0 %v1662_v6 }
  0xd6   : > { %1451 = vmatmul.mubr.msk.bf16.vlgmr.msra.gmra.mrb[0].mxu1 %vm204_vm3, %v1375_v13  ;;  %1384 = vmatprep.subr.msk.bf16.mxu0 %vm208_vm2, %v954_v16 }
  0xd7   : > { %1455 = vmatpush3.bf16.msra.mxu1 %v856_v17  ;;  %1456 = vmatprep.mubr.msk.bf16.mxu1 %vm1663_vm0, %v1661_v5 }
  0xd8   : > { %1460 = vmatprep.subr.bf16.mxu1 %v1661_v5 }
  0xe0   : > { %1381 = vmatmul.mubr.msk.bf16.vlgmr.msra.gmra.mrb[0].mxu0 %vm204_vm3, %v1379_v23 }
  0xe1   : > { %969 = vmatpush1.bf16.msra.mxu0 %v960_v25  ;;  %1000 = vmatprep.mubr.bf16.mxu0 %v1662_v6 }
  0xe2   : > { %1457 = vmatmul.mubr.msk.bf16.vlgmr.msra.gmra.mrb[0].mxu1 %vm204_vm3, %v1379_v23  ;;  %1388 = vmatprep.subr.msk.bf16.mxu0 %vm208_vm2, %v1064_v26 }
  0xe3   : > { %1461 = vmatpush3.bf16.msra.mxu1 %v966_v27  ;;  %1462 = vmatprep.mubr.msk.bf16.mxu1 %vm1663_vm0, %v1661_v5 }
  0xe4   : > { %1466 = vmatprep.subr.bf16.mxu1 %v1661_v5 }
  0xec   : > { %1385 = vmatmul.mubr.msk.bf16.vlgmr.msra.gmra.mrb[0].mxu0 %vm204_vm3, %v1383_v30 }
  0xed   : > { %1079 = vmatpush1.bf16.msra.mxu0 %v1070_v32  ;;  %1110 = vmatprep.mubr.bf16.mxu0 %v1662_v6 }
  0xee   : > { %1463 = vmatmul.mubr.msk.bf16.vlgmr.msra.gmra.mrb[0].mxu1 %vm204_vm3, %v1383_v30 }
  0xef   : > { %1467 = vmatpush3.bf16.msra.mxu1 %v1076_v33  ;;  %1468 = vmatprep.mubr.msk.bf16.mxu1 %vm1663_vm0, %v1661_v5 }
  0xf0   : > { %1472 = vmatprep.subr.bf16.mxu1 %v1661_v5 }
  0xf8   : > { %1389 = vmatmul.mubr.msk.bf16.vlgmr.msra.gmra.mrb[0].mxu0 %vm204_vm3, %v1387_v34 }
  0xf9   : > { %1218 = vmatprep.mubr.bf16.mxu0 %v1662_v6 }
  0xfa   : > { %1469 = vmatmul.mubr.msk.bf16.vlgmr.msra.gmra.mrb[0].mxu1 %vm204_vm3, %v1387_v34 }
  0xfb   : > { %1474 = vmatprep.mubr.msk.bf16.mxu1 %vm1663_vm0, %v1661_v5 }
 0x1cb   : > { %v1112_v35 = vpop.f32.mrb[0].mxu0 }
 0x1cc   : > { %v1162_v36 = vmul.f32 0.2, %v1112_v35  ;;  %v1114_v37 = vpop.f32.mrb[1].mxu0 }
 0x1cd   : > { %v1163_v38 = vmul.f32 0.2, %v1114_v37  ;;  %v1116_v39 = vpop.f32.mrb[2].mxu0  ;;  %v1153_v40 = vpop.f32.mrb[0].mxu1 }
 0x1ce   : > { %v1165_v41 = vmax.f32 %v1112_v35, %v1162_v36  ;;  %v1164_v42 = vmul.f32 0.2, %v1153_v40  ;;  %v1117_v43 = vpop.f32.mrb[3].mxu0  ;;  %v1470_v44 = vpop.f32.mrb[1].mxu1 }
 0x1cf   : > { %v1166_v45 = vmax.f32 %v1114_v37, %v1163_v38  ;;  %v1156_v46 = vpop.f32.mrb[2].mxu1 }
 0x1d0   : > { %v1169_v6 = vpack.c.bf16 %v1165_v41, %v1165_v41  ;;  %v1167_v47 = vmax.f32 %v1153_v40, %v1164_v42  ;;  %v1471_v48 = vpop.f32.mrb[3].mxu1 }
 0x1d1   : > { %v1170_v49 = vpack.c.bf16 %v1166_v45, %v1166_v45 }
 0x1d2   : > { %v1171_v5 = vpack.c.bf16 %v1167_v47, %v1167_v47  ;;  %v1178_v50 = vsel %vm1176_vm11, %v1169_v6, 0 }
 0x1d3   : > { %1391 = vmatprep.subr.msk.bf16.mxu0 %vm1176_vm11, %v1170_v49 }
 0x1d4   : > { %1187 = vmatpush1.bf16.msra.mxu0 %v1178_v50  ;;  %v1184_v51 = vsel %vm1176_vm11, %v1171_v5, 0 }
 0x1d5   : > { %1473 = vmatpush3.bf16.msra.mxu1 %v1184_v51 }
 0x1d7   : > { %1392 = vmatmul.mubr.msk.bf16.vlgmr.msra.gmra.mrb[4].mxu0 %vm1172_vm12, %v1168_v52 }
 0x1d8   : > { %1475 = vmatmul.mubr.msk.bf16.vlgmr.msra.gmra.mrb[4].mxu1 %vm1172_vm12, %v1168_v52 }
 0x2aa   : > { %v1220_v53 = vpop.f32.mrb[4].mxu0 }
 0x2ab   : > { %v1267_v54 = vmul.f32 0.2, %v1220_v53  ;;  %v1222_v55 = vpop.f32.mrb[5].mxu0  ;;  %v1261_v56 = vpop.f32.mrb[4].mxu1 }
 0x2ac   : > { %v1268_v57 = vmul.f32 0.2, %v1222_v55  ;;  %v1269_v58 = vmul.f32 0.2, %v1261_v56  ;;  %v1224_v59 = vpop.f32.mrb[6].mxu0  ;;  %v1476_v60 = vpop.f32.mrb[5].mxu1 }
 0x2ad   : > { %v1270_v61 = vmax.f32 %v1220_v53, %v1267_v54  ;;  %v1225_v62 = vpop.f32.mrb[7].mxu0  ;;  %v1264_v63 = vpop.f32.mrb[6].mxu1 }
 0x2ae   : > { %v1271_v0 = vmax.f32 %v1222_v55, %v1268_v57  ;;  %v1272_v1 = vmax.f32 %v1261_v56, %v1269_v58  ;;  %v1477_v2 = vpop.f32.mrb[7].mxu1 }
 0x2af   : > { %1273 = vst [vmem:[%s163_s24] sm:$0xff] %v1270_v61 }
 0x2b0   : > { %1274 = vst [vmem:[%s163_s24 + $0x8] sm:$0xff] %v1271_v0  ;;  %1275 = vst [vmem:[%s163_s24 + $0x10] sm:$0xff] %v1272_v1 }
 0x2b1   : > { %1609 = shalt.err (!%p1606_p3)
}
 0x2b2   : > { %s1610_s6 = scalar_lea.hbm %s1887_s16, 384  ;;  %s1614_s9 = scalar_lea.hbm %s1932_s3, 768 }
 0x2b3   : > { %p1611_p4 = scmp.ne.s32.totalorder %s1887_s16, %s1610_s6  ;;  %p1615_p9 = scmp.lt.u32.totalorder %s1887_s16, %s1932_s3 }
 0x2b4   : > { %p1616_p10 = scmp.lt.u32.totalorder %s1614_s9, %s1610_s6  ;;  %p1618_p12 = scmp.lt.u32.totalorder %s1610_s6, %s1887_s16 }
 0x2b5   : > { %p1612_p7 = pnand %p1611_p4, %p1731_p5 }
 0x2b6   : > { %p1617_p11 = por %p1616_p10, %p1615_p9 }
 0x2b7   : > { %p1613_p8 = pneg %p1612_p7 }
 0x2b8   : > { %p1619_p13 = por %p1618_p12, %p1617_p11 }
 0x2ba   : > { %p1620_p0 = pnand %p1619_p13, %p1613_p8 }
 0x2bc   : > { %1623 = shalt.err (!%p1620_p0)
}
 0x2bd   : > { %1544 = dma.vmem_to_hbm [thread:$0]  (%p1731_p5), %s1889_s25, 384, %s1887_s16, %s1277_s28  }
 0x2be PF: > { %p1550_p1 = scmp.ge.s32.totalorder %s1658_s15, 2  ;;  %s1303_s17 = sand.u32 1, %s1646_s12  }
 0x2bf   : > { %s1304_s19 = scalar_lea.sflag [#allocation3], %s1303_s17 }
 0x2c0   : > { %p1547_p2 = pnand %p1550_p1, %p1735_p6 }
 0x2c2   : > { %1641 = dma.done.wait (!%p1547_p2), %s1304_s19, 384  }
 0x2c3   : > { %1643 = vsyncadd (!%p1547_p2), %s1304_s19, 4294966912  ;;  %p13_p3 = scmp.ge.s32.totalorder %s1718_s18, 4   ;;  %s1935_s12 = smov %s1650_s13 }
 0x2c4   : > { %s1936_s13 = smov %s1654_s14  ;;  %s1937_s14 = smov %s1729_s21 }
 0x2c5   : > { %s1938_s15 = smov %s1718_s18  ;;  %15 = sbr.rel (!%p13_p3) target bundleno = 3 (0x3), region = 75 }
 0x2cc   :  { %1309 = vsyncpa [#allocation3], 1 }
 0x2cd   :  { %1311 = vsyncpa [#allocation3 + $0x1], 1 }

</bundles_post_ra>
